<compile_context>
chip_gen: v5e
topology: v5e:2x2
jax: 0.10.0
libtpu: 0.0.40
codegen_flags: <defaults>
</compile_context>

<pallas_src>
import functools

import jax
import jax.numpy as jnp
from jax import lax
from jax.experimental import pallas as pl
from jax.experimental.pallas import tpu as pltpu

_LANE = 128


def _accumulate(x_ref, sum_acc, max_acc, *, tile, base, hw_true, masked):
    """Accumulate one (C, tile) spatial tile into wide (C, 128) f32 sum/max
    accumulators via lane-aligned 128-wide chunks (no per-tile XLU reduce).

    `masked` is a *static* flag; the mask is only compiled in for the kernel
    path that handles the ragged last tile.
    """
    n_full, rem = divmod(tile, _LANE)

    def chunk(start, width):
        x = x_ref[:, start:start + width].astype(jnp.float32)
        if masked:
            lane = lax.broadcasted_iota(jnp.int32, x.shape, 1)
            ok = (base + start + lane) < hw_true
            return jnp.where(ok, x, 0.0), jnp.where(ok, x, -jnp.inf)
        return x, x

    for k in range(n_full):
        xs, xm = chunk(k * _LANE, _LANE)
        sum_acc[...] += xs
        max_acc[...] = jnp.maximum(max_acc[...], xm)
    if rem:
        xs, xm = chunk(n_full * _LANE, rem)
        sum_acc[:, :rem] += xs
        max_acc[:, :rem] = jnp.maximum(max_acc[:, :rem], xm)


def _pool_gate_kernel(x_ref, wsq_ref, wex_ref, gate_ref, sum_acc, max_acc, *,
                      hw_true, tile, mask_tail):
    """Fused avg+max pool -> squeeze conv -> excite conv -> sigmoid.

    x_ref   : (C, tile)   spatial tile of one batch element (lanes = space)
    wsq_ref : (C//2, C)   Conv_Squeeze weight (resident)
    wex_ref : (C, C//2)   Conv_Excitation weight (resident)
    gate_ref: (C, 1)      per-batch sigmoid gate, dtype = u.dtype
    sum_acc : (C, 128) f32 wide running spatial sum
    max_acc : (C, 128) f32 wide running spatial max
    """
    t = pl.program_id(1)
    last = pl.num_programs(1) - 1

    @pl.when(t == 0)
    def _init():
        sum_acc[...] = jnp.zeros_like(sum_acc)
        max_acc[...] = jnp.full_like(max_acc, -jnp.inf)

    def accum(masked):
        _accumulate(x_ref, sum_acc, max_acc, tile=tile, base=t * tile,
                    hw_true=hw_true, masked=masked)

    if mask_tail:
        @pl.when(t < last)
        def _interior():
            accum(False)

        @pl.when(t == last)
        def _tail():
            accum(True)
    else:
        accum(False)

    # NOTE: gate's block index is constant in t, so this output block only
    # reaches HBM after the last spatial tile (revisited-output semantics);
    # earlier iterations never observe the uninitialized buffer.
    @pl.when(t == last)
    def _finalize():
        z = (jnp.sum(sum_acc[...], axis=-1, keepdims=True) * (1.0 / hw_true)
             + jnp.max(max_acc[...], axis=-1, keepdims=True))          # (C,1)
        zb = jnp.broadcast_to(z, (z.shape[0], _LANE))                  # lane-dense RHS
        h = jnp.dot(wsq_ref[...].astype(jnp.float32), zb,
                    preferred_element_type=jnp.float32)                # (C//2,128)
        g = jnp.dot(wex_ref[...].astype(jnp.float32), h,
                    preferred_element_type=jnp.float32)                # (C,128)
        gate_ref[...] = (1.0 / (1.0 + jnp.exp(-g[:, 0:1]))).astype(gate_ref.dtype)


def _pool_stats_kernel(x_ref, sum_ref, max_ref, sum_acc, max_acc, *,
                       hw_true, tile, t_total, t_per_split, mask_tail,
                       guard_overrun):
    """Partial avg/max pooling over one spatial half (v7x / N==1 split path).

    Writes per-(batch, split) partial sum/max of shape (C, 1) in f32.
    """
    s = pl.program_id(1)
    t = pl.program_id(2)
    gt = s * t_per_split + t          # global spatial-tile index

    @pl.when(t == 0)
    def _init():
        sum_acc[...] = jnp.zeros_like(sum_acc)
        max_acc[...] = jnp.full_like(max_acc, -jnp.inf)

    def accum(masked):
        _accumulate(x_ref, sum_acc, max_acc, tile=tile, base=gt * tile,
                    hw_true=hw_true, masked=masked)

    if mask_tail:
        @pl.when(gt < t_total - 1)
        def _interior():
            accum(False)

        @pl.when(gt == t_total - 1)
        def _tail():
            accum(True)
    elif guard_overrun:
        @pl.when(gt < t_total)
        def _interior():
            accum(False)
    else:
        accum(False)

    @pl.when(t == t_per_split - 1)
    def _finalize():
        sum_ref[...] = jnp.sum(sum_acc[...], axis=-1, keepdims=True)
        max_ref[...] = jnp.max(max_acc[...], axis=-1, keepdims=True)


def _expand_kernel(gate_ref, o_ref):
    """Broadcast the per-batch gate (C,1) along lanes into (C, tile)."""
    o_ref[...] = jnp.broadcast_to(gate_ref[...], o_ref.shape).astype(o_ref.dtype)


def _pick_tile(hw, c, itemsize, block_budget_bytes, max_lanes):
    """Largest lane tile whose (C, tile) block fits the byte budget and the
    unroll cap; full extent when it fits, else a multiple of 128."""
    if hw <= max_lanes and c * hw * itemsize <= block_budget_bytes:
        return hw
    tile = min(max_lanes, block_budget_bytes // max(1, c * itemsize))
    return max(_LANE, (tile // _LANE) * _LANE)


def global_se_pallas(u, w_sq, w_ex, *, tile_hw=None, tile_hw_expand=None):
    """global_SE forward.

    u    : (N, C, H, W)  input feature map (NCHW, any float dtype)
    w_sq : (C//2, C)     Conv_Squeeze weight ((C//2, C, 1, 1) reshaped)
    w_ex : (C, C//2)     Conv_Excitation weight ((C, C//2, 1, 1) reshaped)
    returns (N, C, H, W) sigmoid gate broadcast over the spatial dims.
    """
    N, C, H, W = u.shape
    C_half = w_sq.shape[0]
    HW = H * W
    x = u.reshape(N, C, HW)                      # contiguous: space on lanes

    in_isz = jnp.dtype(u.dtype).itemsize
    w_isz = jnp.dtype(w_sq.dtype).itemsize
    w_bytes = 2 * C * C_half * w_isz             # both 1x1-conv weights
    acc_bytes = 2 * C * _LANE * 4                # wide f32 sum/max scratch

    # ---- pass-1 spatial (lane) tile ---------------------------------------
    if tile_hw is None:
        budget1 = max(1 << 20,
                      min(8 << 20, ((36 << 20) - 2 * w_bytes - acc_bytes) // 2))
        tile1 = _pick_tile(HW, C, in_isz, budget1, max_lanes=8192)
    else:
        tile1 = HW if tile_hw >= HW else max(_LANE, (tile_hw // _LANE) * _LANE)
    T = pl.cdiv(HW, tile1)
    mask_tail = (T * tile1 != HW)

    # ---- pass-2 spatial tile (pure store bandwidth: go bigger) ------------
    if tile_hw_expand is None:
        tile2 = _pick_tile(HW, C, in_isz, 16 << 20, max_lanes=16384)
    else:
        tile2 = (HW if tile_hw_expand >= HW
                 else max(_LANE, (tile_hw_expand // _LANE) * _LANE))
    T2 = pl.cdiv(HW, tile2)

    # v7x has 2 TensorCores: when N==1 give pass 1 a second parallel axis by
    # splitting the spatial reduction into 2 halves.
    use_split = (N == 1) and (T >= 2)

    if not use_split:
        kernel1 = functools.partial(_pool_gate_kernel, hw_true=HW, tile=tile1,
                                    mask_tail=mask_tail)
        vmem1 = int(2 * C * tile1 * in_isz + 2 * w_bytes + acc_bytes
                    + 2 * C * in_isz + (8 << 20))
        gate = pl.pallas_call(
            kernel1,
            out_shape=jax.ShapeDtypeStruct((N, C, 1), u.dtype),
            grid=(N, T),
            in_specs=[
                pl.BlockSpec((None, C, tile1), lambda n, t: (n, 0, t)),
                pl.BlockSpec((C_half, C), lambda n, t: (0, 0)),    # resident
                pl.BlockSpec((C, C_half), lambda n, t: (0, 0)),    # resident
            ],
            out_specs=pl.BlockSpec((None, C, 1), lambda n, t: (n, 0, 0)),
            scratch_shapes=[pltpu.VMEM((C, _LANE), jnp.float32),
                            pltpu.VMEM((C, _LANE), jnp.float32)],
            compiler_params=pltpu.CompilerParams(
                dimension_semantics=("parallel", "arbitrary"),
                vmem_limit_bytes=vmem1),
        )(x, w_sq, w_ex)
    else:
        S = 2
        T_ps = pl.cdiv(T, S)
        guard_overrun = (S * T_ps != T)
        if guard_overrun:
            x_map = lambda n, s, t: (n, 0, jnp.minimum(s * T_ps + t, T - 1))
        else:
            x_map = lambda n, s, t: (n, 0, s * T_ps + t)
        kernel1 = functools.partial(_pool_stats_kernel, hw_true=HW, tile=tile1,
                                    t_total=T, t_per_split=T_ps,
                                    mask_tail=mask_tail,
                                    guard_overrun=guard_overrun)
        vmem1 = int(2 * C * tile1 * in_isz + acc_bytes + 8 * C * 4 + (8 << 20))
        sum_p, max_p = pl.pallas_call(
            kernel1,
            out_shape=(jax.ShapeDtypeStruct((N, S, C, 1), jnp.float32),
                       jax.ShapeDtypeStruct((N, S, C, 1), jnp.float32)),
            grid=(N, S, T_ps),
            in_specs=[pl.BlockSpec((None, C, tile1), x_map)],
            out_specs=(
                pl.BlockSpec((None, None, C, 1), lambda n, s, t: (n, s, 0, 0)),
                pl.BlockSpec((None, None, C, 1), lambda n, s, t: (n, s, 0, 0)),
            ),
            scratch_shapes=[pltpu.VMEM((C, _LANE), jnp.float32),
                            pltpu.VMEM((C, _LANE), jnp.float32)],
            compiler_params=pltpu.CompilerParams(
                dimension_semantics=("parallel", "parallel", "arbitrary"),
                vmem_limit_bytes=vmem1),
        )(x)
        # O(N*C) combine + 1x1 convs + sigmoid in the wrapper (negligible).
        z = (jnp.sum(sum_p, axis=1) * (1.0 / HW) + jnp.max(max_p, axis=1))[..., 0]
        h = jnp.einsum('nc,dc->nd', z, w_sq.astype(jnp.float32))
        g = jnp.einsum('nd,cd->nc', h, w_ex.astype(jnp.float32))
        gate = jax.nn.sigmoid(g).astype(u.dtype)[..., None]       # (N, C, 1)

    # Pass 2: expand the tiny gate to full spatial size (lane-dense stores;
    # boundary blocks are clipped by Pallas, so no pad / slice needed).
    vmem2 = int(2 * C * tile2 * in_isz + 2 * C * in_isz + (8 << 20))
    out = pl.pallas_call(
        _expand_kernel,
        out_shape=jax.ShapeDtypeStruct((N, C, HW), u.dtype),
        grid=(N, T2),
        in_specs=[pl.BlockSpec((None, C, 1), lambda n, t: (n, 0, 0))],
        out_specs=pl.BlockSpec((None, C, tile2), lambda n, t: (n, 0, t)),
        compiler_params=pltpu.CompilerParams(
            dimension_semantics=("parallel", "parallel"),
            vmem_limit_bytes=vmem2),
    )(gate)

    return out.reshape(N, C, H, W)


def global_se_reference(u, w_sq, w_ex):
    """Pure-JAX reference matching the PyTorch forward."""
    avg = jnp.mean(u, axis=(2, 3))
    mx = jnp.max(u, axis=(2, 3))
    z = avg + mx
    h = jnp.einsum('nc,dc->nd', z, w_sq)
    g = jnp.einsum('nd,cd->nc', h, w_ex)
    gate = jax.nn.sigmoid(g)
    return jnp.broadcast_to(gate[:, :, None, None], u.shape)


if __name__ == "__main__":
    root = jax.random.PRNGKey(0)

    def check(n, c, h, w, **kw):
        key = jax.random.fold_in(root, n * 100000 + c * 1000 + h * 10 + w)
        k1, k2, k3 = jax.random.split(key, 3)
        u = jax.random.normal(k1, (n, c, h, w), dtype=jnp.float32)
        w_sq = jax.random.normal(k2, (c // 2, c), dtype=jnp.float32) * 0.1
        w_ex = jax.random.normal(k3, (c, c // 2), dtype=jnp.float32) * 0.1
        out = jax.block_until_ready(global_se_pallas(u, w_sq, w_ex, **kw))
        ref = global_se_reference(u, w_sq, w_ex)
        assert out.shape == u.shape, (out.shape, u.shape)
        assert jnp.allclose(out, ref, atol=1e-5, rtol=1e-5), (n, c, h, w, kw)

    # Primary small demo shape consistent with the module.
    check(2, 4, 16, 16)
    # Fused multi-tile path with a ragged spatial tail (HW=300, tile=128).
    check(2, 8, 6, 50, tile_hw=128, tile_hw_expand=128)
    # N==1 split path, even number of tiles (HW=130 -> T=2, ragged tail).
    check(1, 8, 10, 13, tile_hw=128, tile_hw_expand=128)
    # N==1 split path, odd number of tiles (overrun guard + clamped index_map).
    check(1, 8, 10, 30, tile_hw=128, tile_hw_expand=256)
    # Single full-extent tile narrower than 128 lanes (remainder-chunk path).
    check(2, 4, 3, 10)

    print("KERNEL_OK")
</pallas_src>

<mosaic_0001>
module attributes {stable_mosaic.version = 11 : i64} {
  func.func @_pool_gate_kernel(%arg0: i32, %arg1: i32, %arg2: memref<1x4x256xf32, #tpu.memory_space<vmem>>, %arg3: memref<2x4xf32, #tpu.memory_space<vmem>>, %arg4: memref<4x2xf32, #tpu.memory_space<vmem>>, %arg5: memref<1x4x1xf32, #tpu.memory_space<vmem>>, %arg6: memref<4x128xf32, #tpu.memory_space<vmem>>, %arg7: memref<4x128xf32, #tpu.memory_space<vmem>>) attributes {dimension_semantics = [#tpu.dimension_semantics<parallel>, #tpu.dimension_semantics<arbitrary>], iteration_bounds = array<i64: 2, 1>, scalar_prefetch = 0 : i64, scratch_operands = 2 : i64, tpu.core_type = #tpu.core_type<tc>, window_params = [{transform_indices = @transform_0, window_bounds = array<i64: 1, 4, 256>}, {pipeline_mode = #tpu.pipeline_mode<synchronous>, transform_indices = @transform_1, window_bounds = array<i64: 2, 4>}, {pipeline_mode = #tpu.pipeline_mode<synchronous>, transform_indices = @transform_2, window_bounds = array<i64: 4, 2>}, {transform_indices = @transform_3, window_bounds = array<i64: 1, 4, 1>}]} {
    %c0_i32 = arith.constant 0 : i32
    %0 = arith.cmpi eq, %arg1, %c0_i32 : i32
    %1 = arith.extui %0 : i1 to i32
    %c0_i32_0 = arith.constant 0 : i32
    %2 = arith.cmpi ne, %1, %c0_i32_0 : i32
    scf.if %2 {
      %cst = arith.constant 0.000000e+00 : f32
      %22 = vector.broadcast %cst : f32 to vector<4x128xf32>
      %c0_23 = arith.constant 0 : index
      %c0_24 = arith.constant 0 : index
      %23 = vector.load %arg6[%c0_23, %c0_24] : memref<4x128xf32, #tpu.memory_space<vmem>>, vector<4x128xf32>
      tpu.vector_store %arg6[%c0_23, %c0_24], %22 {strides = array<i32>} : memref<4x128xf32, #tpu.memory_space<vmem>>, vector<4x128xf32>,
      %cst_25 = arith.constant 0xFF800000 : f32
      %24 = vector.broadcast %cst_25 : f32 to vector<4x128xf32>
      %c0_26 = arith.constant 0 : index
      %c0_27 = arith.constant 0 : index
      %25 = vector.load %arg7[%c0_26, %c0_27] : memref<4x128xf32, #tpu.memory_space<vmem>>, vector<4x128xf32>
      tpu.vector_store %arg7[%c0_26, %c0_27], %24 {strides = array<i32>} : memref<4x128xf32, #tpu.memory_space<vmem>>, vector<4x128xf32>,
    } else {
    }
    %c0 = arith.constant 0 : index
    %c0_1 = arith.constant 0 : index
    %c0_2 = arith.constant 0 : index
    %3 = vector.load %arg2[%c0, %c0_1, %c0_2] : memref<1x4x256xf32, #tpu.memory_space<vmem>>, vector<1x4x128xf32>
    %4 = vector.shape_cast %3 : vector<1x4x128xf32> to vector<4x128xf32>
    %c0_3 = arith.constant 0 : index
    %c0_4 = arith.constant 0 : index
    %5 = vector.load %arg6[%c0_3, %c0_4] : memref<4x128xf32, #tpu.memory_space<vmem>>, vector<4x128xf32>
    %6 = arith.addf %5, %4 : vector<4x128xf32>
    %c0_5 = arith.constant 0 : index
    %c0_6 = arith.constant 0 : index
    %7 = vector.load %arg6[%c0_5, %c0_6] : memref<4x128xf32, #tpu.memory_space<vmem>>, vector<4x128xf32>
    tpu.vector_store %arg6[%c0_5, %c0_6], %6 {strides = array<i32>} : memref<4x128xf32, #tpu.memory_space<vmem>>, vector<4x128xf32>,
    %c0_7 = arith.constant 0 : index
    %c0_8 = arith.constant 0 : index
    %8 = vector.load %arg7[%c0_7, %c0_8] : memref<4x128xf32, #tpu.memory_space<vmem>>, vector<4x128xf32>
    %9 = arith.maximumf %8, %4 : vector<4x128xf32>
    %c0_9 = arith.constant 0 : index
    %c0_10 = arith.constant 0 : index
    %10 = vector.load %arg7[%c0_9, %c0_10] : memref<4x128xf32, #tpu.memory_space<vmem>>, vector<4x128xf32>
    tpu.vector_store %arg7[%c0_9, %c0_10], %9 {strides = array<i32>} : memref<4x128xf32, #tpu.memory_space<vmem>>, vector<4x128xf32>,
    %c0_11 = arith.constant 0 : index
    %c0_12 = arith.constant 0 : index
    %c128 = arith.constant 128 : index
    %11 = vector.load %arg2[%c0_11, %c0_12, %c128] : memref<1x4x256xf32, #tpu.memory_space<vmem>>, vector<1x4x128xf32>
    %12 = vector.shape_cast %11 : vector<1x4x128xf32> to vector<4x128xf32>
    %c0_13 = arith.constant 0 : index
    %c0_14 = arith.constant 0 : index
    %13 = vector.load %arg6[%c0_13, %c0_14] : memref<4x128xf32, #tpu.memory_space<vmem>>, vector<4x128xf32>
    %14 = arith.addf %13, %12 : vector<4x128xf32>
    %c0_15 = arith.constant 0 : index
    %c0_16 = arith.constant 0 : index
    %15 = vector.load %arg6[%c0_15, %c0_16] : memref<4x128xf32, #tpu.memory_space<vmem>>, vector<4x128xf32>
    tpu.vector_store %arg6[%c0_15, %c0_16], %14 {strides = array<i32>} : memref<4x128xf32, #tpu.memory_space<vmem>>, vector<4x128xf32>,
    %c0_17 = arith.constant 0 : index
    %c0_18 = arith.constant 0 : index
    %16 = vector.load %arg7[%c0_17, %c0_18] : memref<4x128xf32, #tpu.memory_space<vmem>>, vector<4x128xf32>
    %17 = arith.maximumf %16, %12 : vector<4x128xf32>
    %c0_19 = arith.constant 0 : index
    %c0_20 = arith.constant 0 : index
    %18 = vector.load %arg7[%c0_19, %c0_20] : memref<4x128xf32, #tpu.memory_space<vmem>>, vector<4x128xf32>
    tpu.vector_store %arg7[%c0_19, %c0_20], %17 {strides = array<i32>} : memref<4x128xf32, #tpu.memory_space<vmem>>, vector<4x128xf32>,
    %c0_i32_21 = arith.constant 0 : i32
    %19 = arith.cmpi eq, %arg1, %c0_i32_21 : i32
    %20 = arith.extui %19 : i1 to i32
    %c0_i32_22 = arith.constant 0 : i32
    %21 = arith.cmpi ne, %20, %c0_i32_22 : i32
    scf.if %21 {
      %c0_23 = arith.constant 0 : index
      %c0_24 = arith.constant 0 : index
      %22 = vector.load %arg6[%c0_23, %c0_24] : memref<4x128xf32, #tpu.memory_space<vmem>>, vector<4x128xf32>
      %cst = arith.constant dense<0.000000e+00> : vector<4xf32>
      %23 = vector.multi_reduction <add>, %22, %cst [1] : vector<4x128xf32> to vector<4xf32>
      %24 = vector.shape_cast %23 : vector<4xf32> to vector<4x1xf32>
      %cst_25 = arith.constant 3.906250e-03 : f32
      %25 = vector.broadcast %cst_25 : f32 to vector<4x1xf32>
      %26 = arith.mulf %24, %25 : vector<4x1xf32>
      %c0_26 = arith.constant 0 : index
      %c0_27 = arith.constant 0 : index
      %27 = vector.load %arg7[%c0_26, %c0_27] : memref<4x128xf32, #tpu.memory_space<vmem>>, vector<4x128xf32>
      %cst_28 = arith.constant dense<0xFF800000> : vector<4xf32>
      %28 = vector.multi_reduction <maximumf>, %27, %cst_28 [1] : vector<4x128xf32> to vector<4xf32>
      %29 = vector.shape_cast %28 : vector<4xf32> to vector<4x1xf32>
      %30 = arith.addf %26, %29 : vector<4x1xf32>
      %31 = vector.shape_cast %30 : vector<4x1xf32> to vector<4x1xf32>
      %32 = vector.broadcast %31 : vector<4x1xf32> to vector<4x128xf32>
      %c0_29 = arith.constant 0 : index
      %c0_30 = arith.constant 0 : index
      %33 = vector.load %arg3[%c0_29, %c0_30] : memref<2x4xf32, #tpu.memory_space<vmem>>, vector<2x4xf32>
      %cst_31 = arith.constant dense<0.000000e+00> : vector<2x128xf32>
      %34 = tpu.matmul %33, %32, %cst_31 {dimension_numbers = #tpu.dot_dimension_numbers<[1], [0], [0], [1], [0, 0, 1, 1], [], []>} : vector<2x4xf32>, vector<4x128xf32>, vector<2x128xf32> -> vector<2x128xf32>
      %c0_32 = arith.constant 0 : index
      %c0_33 = arith.constant 0 : index
      %35 = vector.load %arg4[%c0_32, %c0_33] : memref<4x2xf32, #tpu.memory_space<vmem>>, vector<4x2xf32>
      %cst_34 = arith.constant dense<0.000000e+00> : vector<4x128xf32>
      %36 = tpu.matmul %35, %34, %cst_34 {dimension_numbers = #tpu.dot_dimension_numbers<[1], [0], [0], [1], [0, 0, 1, 1], [], []>} : vector<4x2xf32>, vector<2x128xf32>, vector<4x128xf32> -> vector<4x128xf32>
      %37 = vector.extract_strided_slice %36 {offsets = [0, 0], sizes = [4, 1], strides = [1, 1]} : vector<4x128xf32> to vector<4x1xf32>
      %cst_35 = arith.constant 0.000000e+00 : f32
      %38 = vector.broadcast %cst_35 : f32 to vector<4x1xf32>
      %39 = arith.subf %38, %37 : vector<4x1xf32>
      %40 = math.exp %39 : vector<4x1xf32>
      %cst_36 = arith.constant 1.000000e+00 : f32
      %41 = vector.broadcast %cst_36 : f32 to vector<4x1xf32>
      %42 = arith.addf %41, %40 : vector<4x1xf32>
      %cst_37 = arith.constant 1.000000e+00 : f32
      %43 = vector.broadcast %cst_37 : f32 to vector<4x1xf32>
      %44 = arith.divf %43, %42 : vector<4x1xf32>
      %c0_38 = arith.constant 0 : index
      %c0_39 = arith.constant 0 : index
      %c0_40 = arith.constant 0 : index
      %45 = vector.load %arg5[%c0_38, %c0_39, %c0_40] : memref<1x4x1xf32, #tpu.memory_space<vmem>>, vector<1x4x1xf32>
      %46 = vector.shape_cast %45 : vector<1x4x1xf32> to vector<4x1xf32>
      %47 = vector.shape_cast %44 : vector<4x1xf32> to vector<1x4x1xf32>
      tpu.vector_store %arg5[%c0_38, %c0_39, %c0_40], %47 {strides = array<i32>} : memref<1x4x1xf32, #tpu.memory_space<vmem>>, vector<1x4x1xf32>,
    } else {
    }
    return
  }
  func.func @transform_0(%arg0: i32, %arg1: i32) -> (i32, i32, i32) {
    %c0_i32 = arith.constant 0 : i32
    %c0_i32_0 = arith.constant 0 : i32
    return %arg0, %c0_i32, %arg1 : i32, i32, i32
  }
  func.func @transform_1(%arg0: i32, %arg1: i32) -> (i32, i32) {
    %c0_i32 = arith.constant 0 : i32
    %c0_i32_0 = arith.constant 0 : i32
    %c0_i32_1 = arith.constant 0 : i32
    return %c0_i32, %c0_i32_0 : i32, i32
  }
  func.func @transform_2(%arg0: i32, %arg1: i32) -> (i32, i32) {
    %c0_i32 = arith.constant 0 : i32
    %c0_i32_0 = arith.constant 0 : i32
    %c0_i32_1 = arith.constant 0 : i32
    return %c0_i32, %c0_i32_0 : i32, i32
  }
  func.func @transform_3(%arg0: i32, %arg1: i32) -> (i32, i32, i32) {
    %c0_i32 = arith.constant 0 : i32
    %c0_i32_0 = arith.constant 0 : i32
    %c0_i32_1 = arith.constant 0 : i32
    return %arg0, %c0_i32, %c0_i32_0 : i32, i32, i32
  }
}

</mosaic_0001>

<bundles_post_ra>
// kernel: tpu_custom_call.1
= control target key start
LH: loop header
LB: loop body
LE: loop exit
PB: predicated region body
PF: predicated region fallthrough
CT: control target
= control target key end

     0   :  { %8 = vsyncpa [#allocation5], 0  ;;  %s670_s0 = inlined_call_operand.hbm [shape: f32[2,4,256], index: 0, kind: input, shape index: {}]   ;;  %s671_s1 = inlined_call_operand.vmem [shape: f32[2,4], index: 1, kind: input, shape index: {}]   ;;  %s672_s2 = inlined_call_operand.vmem [shape: f32[4,2], index: 2, kind: input, shape index: {}]   ;;  %s673_s3 = inlined_call_operand.vmem [shape: f32[2,4,1], index: 3, kind: output, shape index: {}]  }
   0x1   :  { %10 = vsyncpa [#allocation5 + $0x1], 0  ;;  %s576_s12 = smov 0   ;;  %s578_s13 = smov 0  }
   0x2   :  { %s580_s14 = smov 0   ;;  %s582_s15 = smov 0  }
   0x3   :  { %s584_s16 = smov 0   ;;  %s586_s17 = smov 0  }
   0x4 LB: > { %s394_s18 = sadd.s32 4294967295, %s552_s17   ;;  %s28_s19 = sadd.s32 1, %s548_s16  ;;  %s552_s17 = sphi %s586_s17, %s16_s17   ;;  %s548_s16 = sphi %s584_s16, %s680_s16   ;;  %s544_s15 = sphi %s582_s15, %s679_s15   ;;  %s540_s14 = sphi %s580_s14, %s678_s14   ;;  %s536_s13 = sphi %s578_s13, %s677_s13   ;;  %s532_s12 = sphi %s576_s12, %s676_s12  }
   0x5   : > { %p30_p0 = scmp.ge.s32.totalorder %s28_s19, 2  ;;  %s37_s20 = sadd.s32 1, %s540_s14 }
   0x6   : > { %p44_p1 = scmp.ne.s32.totalorder %s540_s14, %s536_s13  ;;  %p45_p2 = scmp.eq.s32.totalorder %s552_s17, 0 }
   0x7   : > { %s682_s19 = smov (%p30_p0, %s28_s19), 0  ;;  %p50_p4 = scmp.ne.s32.totalorder %s536_s13, %s532_s12 }
   0x8   : > { %p612_p3 = por %p45_p2, %p44_p1  ;;  %s32_s22 = ssub.s32 %s548_s16, %s682_s19 }
   0x9   : > { %p51_p5 = scmp.eq.s32.totalorder %s394_s18, 0  ;;  %p35_p6 = scmp.eq.s32.totalorder %s32_s22, 0 }
   0xa   : > { %p417_p8 = scmp.lt.s32.totalorder %s552_s17, 2  ;;  %s148_s25 = sand.u32 1, %s540_s14  }
   0xb   : > { %p619_p7 = por %p51_p5, %p50_p4  ;;  %s410_s26 = sshll.u32 %s548_s16, 3 }
   0xc   : > { %s625_s24 = scalar_select %p35_p6, %s540_s14, %s37_s20  }
   0xd   : > { %s398_s27 = sshll.u32 %s148_s25, 3  ;;  %s159_s30 = scalar_lea.hbm %s670_s0, %s410_s26 }
   0xe   : > { %s161_s4 = sshll.u32 %s159_s30, 4  ;;  %s152_s5 = scalar_lea.vmem [#allocation4], %s398_s27  ;;  %s162_s4 = int_to_ptr.hbm [resolvable:$true] %s161_s4 }
   0xf   : > { %s163_s6 = sshll.u32 %s152_s5, 4  ;;  %p414_p9 = pnand %p417_p8, %p612_p3  ;;  %s164_s6 = int_to_ptr.vmem [resolvable:$true] %s163_s6 }
  0x10   : > { %p401_p10 = scmp.ge.s32.totalorder %s552_s17, 1  ;;  %p168_p11 = scmp.lt.s32.totalorder %s552_s17, 3 }
  0x11   : > { %s149_s7 = scalar_lea.sflag [#allocation5], %s148_s25 }
  0x12   : > { %416 = dma.hbm_to_vmem [thread:$0]  (!%p414_p9), %s162_s4, 128, %s164_s6, %s149_s7  }
  0x13   : > { %p169_p12 = pnand %p401_p10, %p168_p11 }
  0x14   : > { %s174_s8 = sand.u32 (!%p169_p12), 1, %s536_s13  }
  0x15   : > { %172 = sbr.rel (%p169_p12) target bundleno = 468 (0x1d4), region = 32  ;;  %s402_s9 = sshll.u32 (!%p169_p12), %s174_s8, 3 }
  0x16   : > { %s175_s10 = scalar_lea.sflag (!%p169_p12), [#allocation5], %s174_s8  ;;  %s178_s11 = scalar_lea.vmem (!%p169_p12), [#allocation4], %s402_s9 }
  0x1a   : > { %527 = dma.done.wait (%p619_p7), %s175_s10, 128  }
  0x1b   : > { %529 = vsyncadd (%p619_p7), %s175_s10, 4294967168  ;;  %v554_v0 = vmov 0.0   ;;  %v555_v1 = vmov -inf   ;;  %v212_v2 = vld [vmem:[%s178_s11] sm:$0xf]  ;;  %vm230_vm0 = vcmask 1043456  }
  0x1c   : > { %210 = vst [vmem:[#allocation2] sm:$0xf] %v554_v0  ;;  %v219_v7 = vld [vmem:[%s178_s11 + $0x4] sm:$0xf]  ;;  %v240_v20 = vld [vmem:[%s671_s1] sm:$0x3] }
  0x1d   : > { %211 = vst [vmem:[#allocation3] sm:$0xf] %v555_v1  ;;  %vm241_vm1 = vcmask 31744   ;;  %vm273_vm2 = vcmask 1041408   ;;  %v268_v21 = vld [vmem:[%s672_s2] sm:$0xf] }
  0x1e   : > { %vm269_vm3 = vcmask 15360   ;;  %p202_p13 = scmp.lt.s32.totalorder %s544_s15, 1  ;;  %vm316_vm7 = vcmask 3072  }
  0x20   : > { %s684_s15 = smov (!%p202_p13, %s544_s15), 1 }
  0x21   : > { %s403_s22 = sshll.u32 %s684_s15, 2 }
  0x22   : > { %s205_s26 = scalar_lea.vmem %s673_s3, %s403_s22 }
  0x23   : > { %v213_v3 = vld [vmem:[#allocation2] sm:$0xf] }
  0x24   : > { %v214_v4 = vadd.f32 %v213_v3, %v212_v2  ;;  %v216_v5 = vld [vmem:[#allocation3] sm:$0xf] }
  0x25   : > { %v217_v6 = vmax.f32 %v216_v5, %v212_v2 }
  0x26   : > { %215 = vst [vmem:[#allocation2] sm:$0xf] %v214_v4 }
  0x27   : > { %218 = vst [vmem:[#allocation3] sm:$0xf] %v217_v6 }
  0x2d   : > { %v220_v8 = vld [vmem:[#allocation2] sm:$0xf] }
  0x2e   : > { %v221_v9 = vadd.f32 %v220_v8, %v219_v7  ;;  %v223_v10 = vld [vmem:[#allocation3] sm:$0xf] }
  0x2f   : > { %v224_v11 = vmax.f32 %v223_v10, %v219_v7 }
  0x30   : > { %222 = vst [vmem:[#allocation2] sm:$0xf] %v221_v9 }
  0x31   : > { %225 = vst [vmem:[#allocation3] sm:$0xf] %v224_v11 }
  0x37   : > { %v229_v12 = vld [vmem:[#allocation2] sm:$0xf] }
  0x38   : > { %v231_v13 = vsel %vm230_vm0, %v229_v12, 0.0  ;;  %v235_v14 = vld [vmem:[#allocation3] sm:$0xf] }
  0x39   : > { %232 = vadd.xlane.f32.xlu0 %v231_v13  ;;  %v236_v15 = vsel %vm230_vm0, %v235_v14, -inf }
  0x41   : > { %237 = vmax.xlane.f32.xlu0 %v236_v15 }
  0xac   : > { %v233_v16 = vpop.xlane.xlu0 %232 }
  0xad   : > { %v234_v17 = vmul.f32 0.00390625, %v233_v16 }
  0xb4   : > { %v238_v18 = vpop.xlane.xlu0 %237 }
  0xb5   : > { %v239_v19 = vadd.f32 %v238_v18, %v234_v17 }
  0xb7   : > { %404 = vmatpush.msk.msra.mxu0 %vm230_vm0, %v239_v19 }
  0xb8   : > { %405 = vmatmul.msk.f32.vlgmr.msra.gmra.mxu0 %vm241_vm1, %v240_v20 }
 0x135   : > { %v265_v22 = vpop.f32.mrf.mxu0 }
 0x136   : > { %406 = vmatpush.msk.msra.mxu1 %vm273_vm2, %v265_v22 }
 0x137   : > { %407 = vmatmul.msk.f32.vlgmr.msra.gmra.mxu1 %vm269_vm3, %v268_v21 }
 0x1b4   : > { %v294_v23 = vpop.f32.mrf.mxu1 }
 0x1b5   : > { %v297_v24 = vsub.f32 0.0, %v294_v23 }
 0x1b7   : > { %v298_v25 = vmul.f32 1.442695, %v297_v24 }
 0x1b9   : > { %468 = vpow2.f32 %v298_v25 }
 0x1bf   : > { %v469_v26 = vpop.eup %468 }
 0x1c0   : > { %v300_v27 = vadd.f32 1.0, %v469_v26 }
 0x1c2   : > { %470 = vrcp.f32 %v300_v27  ;;  %v312_v31 = vand.u32 2147483648, %v300_v27  ;;  %v310_v33 = vand.u32 2147483647, %v300_v27  ;;  %vm306_vm5 = vweird.f32 %v300_v27 }
 0x1c4   : > { %v313_v35 = vor.u32 1.1754944e-38, %v312_v31  ;;  %vm311_vm8 = vcmp.eq.f32.partialorder %v310_v33, 8.507059e+37 }
 0x1c8   : > { %v471_v28 = vpop.eup %470 }
 0x1c9   : > { %v302_v29 = vmul.f32 %v471_v28, %v300_v27  ;;  %vm307_vm4 = vweird.f32 %v471_v28 }
 0x1ca   : > { %vm308_vm6 = vmor %vm306_vm5, %vm307_vm4 }
 0x1cb   : > { %v303_v30 = vsub.f32 1.0, %v302_v29 }
 0x1cd   : > { %v304_v32 = vmul.f32 %v471_v28, %v303_v30 }
 0x1cf   : > { %v305_v34 = vadd.f32 %v471_v28, %v304_v32 }
 0x1d1   : > { %v309_v36 = vsel %vm308_vm6, %v471_v28, %v305_v34 }
 0x1d2   : > { %v314_v37 = vsel %vm311_vm8, %v313_v35, %v309_v36 }
 0x1d3   : > { %317 = vst.msk [vmem:[%s205_s26] sm:$0xf] %vm316_vm7, %v314_v37 }
 0x1d4 PF: > { %s16_s17 = sadd.s32 1, %s552_s17   ;;  %s676_s12 = smov %s536_s13 }
 0x1d5   : > { %p13_p0 = scmp.ge.s32.totalorder %s16_s17, 4   ;;  %s677_s13 = smov %s540_s14 }
 0x1d6   : > { %s678_s14 = smov %s625_s24  ;;  %s679_s15 = smov %s548_s16 }
 0x1d7   : > { %s680_s16 = smov %s682_s19  ;;  %15 = sbr.rel (!%p13_p0) target bundleno = 4 (0x4), region = 80 }
 0x1dc   :  { %337 = vsyncpa [#allocation5], 1 }
 0x1dd   :  { %339 = vsyncpa [#allocation5 + $0x1], 1 }

</bundles_post_ra>
